<compile_context>
chip_gen: v5e
topology: v5e:2x2
jax: 0.10.0
libtpu: 0.0.40
codegen_flags: <defaults>
</compile_context>

<pallas_src>
import functools
import math

import jax
import jax.numpy as jnp
from jax.experimental import pallas as pl
from jax.experimental.pallas import tpu as pltpu

SUBLANES = 8


def _round_up(x, m):
    return (x + m - 1) // m * m


def _policy_net_kernel(x_ref, w1_ref, b1_ref, w2_ref, b2_ref, o_ref):
    # fc1 + ReLU: cast x f32->bf16 on the VPU, MXU matmul with f32 accumulation.
    x = x_ref[...].astype(w1_ref.dtype)
    h = jnp.dot(x, w1_ref[...], preferred_element_type=jnp.float32)
    h = jnp.maximum(h + b1_ref[...].astype(jnp.float32), 0.0)

    # fc2: cast activations to the weight dtype for the MXU, accumulate in f32.
    logits = jnp.dot(h.astype(w2_ref.dtype), w2_ref[...],
                     preferred_element_type=jnp.float32)
    logits = logits + b2_ref[...].astype(jnp.float32)

    # Numerically-stable softmax along the last axis (nn.Softmax(dim=-1)).
    # Denominator uses the EUP approximate reciprocal (rows sum to 1 to ~1e-3,
    # fine for a policy net).
    m = jnp.max(logits, axis=-1, keepdims=True)
    e = jnp.exp(logits - m)
    denom = jnp.sum(e, axis=-1, keepdims=True)
    o_ref[...] = (e * pl.reciprocal(denom, approx=True)).astype(o_ref.dtype)


def prepare_policy_net_params(w1, b1, w2, b2, *, use_bf16=True):
    """One-time weight prep (bf16 cast + bias reshape), hoisted out of the
    per-call forward path. w1: (in_dim, hidden), w2: (hidden, out_dim)."""
    mm_dtype = jnp.bfloat16 if use_bf16 else jnp.float32
    hidden = w1.shape[1]
    out_dim = w2.shape[1]
    w1_mm = jnp.asarray(w1).astype(mm_dtype)
    w2_mm = jnp.asarray(w2).astype(mm_dtype)
    b1_f = jnp.asarray(b1, jnp.float32).reshape(1, hidden)
    b2_f = jnp.asarray(b2, jnp.float32).reshape(1, out_dim)
    return w1_mm, b1_f, w2_mm, b2_f


def _choose_tile(batch, tile_b):
    full = _round_up(batch, SUBLANES)
    if batch > SUBLANES:
        # Ensure >= 2 grid steps so "parallel" can shard across both TCs (v7x).
        cap = _round_up(pl.cdiv(full, 2), SUBLANES)
    else:
        cap = full
    tile = min(_round_up(tile_b, SUBLANES), full, cap)
    return max(tile, SUBLANES)


def policy_net_forward(x, params, *, tile_b=1024):
    """x: (B, in_dim) f32. params: output of prepare_policy_net_params.
    Returns (B, out_dim) f32 softmax probabilities."""
    w1, b1, w2, b2 = params
    batch, in_dim = x.shape
    hidden = w1.shape[1]
    out_dim = w2.shape[1]

    x = x.astype(jnp.float32)          # kernel casts to bf16 internally
    tile = _choose_tile(batch, tile_b)
    grid = (pl.cdiv(batch, tile),)     # partial last block handled by Pallas

    w_itemsize = jnp.dtype(w1.dtype).itemsize
    cost = pl.CostEstimate(
        flops=2 * batch * (in_dim * hidden + hidden * out_dim),
        transcendentals=batch * out_dim,
        bytes_accessed=(batch * in_dim * 4
                        + (in_dim * hidden + hidden * out_dim) * w_itemsize
                        + (hidden + out_dim) * 4
                        + batch * out_dim * 4),
    )

    return pl.pallas_call(
        _policy_net_kernel,
        out_shape=jax.ShapeDtypeStruct((batch, out_dim), jnp.float32),
        grid=grid,
        in_specs=[
            pl.BlockSpec((tile, in_dim), lambda i: (i, 0)),     # x tile (f32)
            pl.BlockSpec((in_dim, hidden), lambda i: (0, 0)),   # w1 resident
            pl.BlockSpec((1, hidden), lambda i: (0, 0)),        # b1 resident
            pl.BlockSpec((hidden, out_dim), lambda i: (0, 0)),  # w2 resident
            pl.BlockSpec((1, out_dim), lambda i: (0, 0)),       # b2 resident
        ],
        out_specs=pl.BlockSpec((tile, out_dim), lambda i: (i, 0)),
        compiler_params=pltpu.CompilerParams(
            dimension_semantics=("parallel",),
            vmem_limit_bytes=32 * 1024 * 1024),
        cost_estimate=cost,
    )(x, w1, b1, w2, b2)


def init_policy_net_params(key, input_dim, output_dim, hidden=128):
    """Deterministic init mimicking torch.nn.Linear default:
    U(-1/sqrt(fan_in), 1/sqrt(fan_in)) for weight and bias.
    Weights stored pre-transposed as (in_features, out_features)."""
    k1, k2, k3, k4 = jax.random.split(key, 4)
    bound1 = 1.0 / math.sqrt(input_dim)
    bound2 = 1.0 / math.sqrt(hidden)
    w1 = jax.random.uniform(k1, (input_dim, hidden), jnp.float32, -bound1, bound1)
    b1 = jax.random.uniform(k2, (1, hidden), jnp.float32, -bound1, bound1)
    w2 = jax.random.uniform(k3, (hidden, output_dim), jnp.float32, -bound2, bound2)
    b2 = jax.random.uniform(k4, (1, output_dim), jnp.float32, -bound2, bound2)
    return w1, b1, w2, b2


def _reference(x, w1, b1, w2, b2):
    h = jnp.maximum(x @ w1 + b1, 0.0)
    logits = h @ w2 + b2
    return jax.nn.softmax(logits, axis=-1)


if __name__ == "__main__":
    key = jax.random.PRNGKey(0)
    input_dim, output_dim = 16, 8
    kx, kp, kx2 = jax.random.split(key, 3)
    w1, b1, w2, b2 = init_policy_net_params(kp, input_dim, output_dim)
    params = prepare_policy_net_params(w1, b1, w2, b2)

    fwd = jax.jit(functools.partial(policy_net_forward, tile_b=1024))

    # Small-shape run (single grid step).
    batch = 8
    x = jax.random.normal(kx, (batch, input_dim), dtype=jnp.float32)
    out = fwd(x, params)
    jax.block_until_ready(out)
    assert out.shape == (batch, output_dim)
    assert bool(jnp.allclose(jnp.sum(out, axis=-1), 1.0, atol=1e-2))
    assert bool(jnp.allclose(out, _reference(x, w1, b1, w2, b2), atol=3e-2))

    # Run exercising a multi-step grid (2 TC shardable) and a partial last
    # block (batch not a multiple of the tile, nor of 8).
    batch2 = 203
    x2 = jax.random.normal(kx2, (batch2, input_dim), dtype=jnp.float32)
    out2 = fwd(x2, params)
    jax.block_until_ready(out2)
    assert out2.shape == (batch2, output_dim)
    assert bool(jnp.allclose(jnp.sum(out2, axis=-1), 1.0, atol=1e-2))
    assert bool(jnp.allclose(out2, _reference(x2, w1, b1, w2, b2), atol=3e-2))

    print("KERNEL_OK")
</pallas_src>

<mosaic_0001>
module attributes {stable_mosaic.version = 11 : i64} {
  func.func @_policy_net_kernel(%arg0: i32, %arg1: memref<8x16xf32, #tpu.memory_space<vmem>>, %arg2: memref<16x128xbf16, #tpu.memory_space<vmem>>, %arg3: memref<1x128xf32, #tpu.memory_space<vmem>>, %arg4: memref<128x8xbf16, #tpu.memory_space<vmem>>, %arg5: memref<1x8xf32, #tpu.memory_space<vmem>>, %arg6: memref<8x8xf32, #tpu.memory_space<vmem>>) attributes {dimension_semantics = [#tpu.dimension_semantics<parallel>], iteration_bounds = array<i64: 1>, scalar_prefetch = 0 : i64, scratch_operands = 0 : i64, tpu.core_type = #tpu.core_type<tc>, window_params = [{transform_indices = @transform_0, window_bounds = array<i64: 8, 16>}, {pipeline_mode = #tpu.pipeline_mode<synchronous>, transform_indices = @transform_1, window_bounds = array<i64: 16, 128>}, {pipeline_mode = #tpu.pipeline_mode<synchronous>, transform_indices = @transform_2, window_bounds = array<i64: 1, 128>}, {pipeline_mode = #tpu.pipeline_mode<synchronous>, transform_indices = @transform_3, window_bounds = array<i64: 128, 8>}, {pipeline_mode = #tpu.pipeline_mode<synchronous>, transform_indices = @transform_4, window_bounds = array<i64: 1, 8>}, {transform_indices = @transform_5, window_bounds = array<i64: 8, 8>}]} {
    %c0 = arith.constant 0 : index
    %c0_0 = arith.constant 0 : index
    %0 = vector.load %arg1[%c0, %c0_0] : memref<8x16xf32, #tpu.memory_space<vmem>>, vector<8x16xf32>
    %1 = arith.truncf %0 : vector<8x16xf32> to vector<8x16xbf16>
    %c0_1 = arith.constant 0 : index
    %c0_2 = arith.constant 0 : index
    %2 = vector.load %arg2[%c0_1, %c0_2] : memref<16x128xbf16, #tpu.memory_space<vmem>>, vector<16x128xbf16>
    %cst = arith.constant dense<0.000000e+00> : vector<8x128xf32>
    %3 = tpu.matmul %1, %2, %cst {dimension_numbers = #tpu.dot_dimension_numbers<[1], [0], [0], [1], [0, 0, 1, 1], [], []>} : vector<8x16xbf16>, vector<16x128xbf16>, vector<8x128xf32> -> vector<8x128xf32>
    %c0_3 = arith.constant 0 : index
    %c0_4 = arith.constant 0 : index
    %4 = vector.load %arg3[%c0_3, %c0_4] : memref<1x128xf32, #tpu.memory_space<vmem>>, vector<1x128xf32>
    %5 = vector.broadcast %4 : vector<1x128xf32> to vector<8x128xf32>
    %6 = arith.addf %3, %5 : vector<8x128xf32>
    %cst_5 = arith.constant 0.000000e+00 : f32
    %7 = vector.broadcast %cst_5 : f32 to vector<8x128xf32>
    %8 = arith.maximumf %6, %7 : vector<8x128xf32>
    %9 = arith.truncf %8 : vector<8x128xf32> to vector<8x128xbf16>
    %c0_6 = arith.constant 0 : index
    %c0_7 = arith.constant 0 : index
    %10 = vector.load %arg4[%c0_6, %c0_7] : memref<128x8xbf16, #tpu.memory_space<vmem>>, vector<128x8xbf16>
    %cst_8 = arith.constant dense<0.000000e+00> : vector<8x8xf32>
    %11 = tpu.matmul %9, %10, %cst_8 {dimension_numbers = #tpu.dot_dimension_numbers<[1], [0], [0], [1], [0, 0, 1, 1], [], []>} : vector<8x128xbf16>, vector<128x8xbf16>, vector<8x8xf32> -> vector<8x8xf32>
    %c0_9 = arith.constant 0 : index
    %c0_10 = arith.constant 0 : index
    %12 = vector.load %arg5[%c0_9, %c0_10] : memref<1x8xf32, #tpu.memory_space<vmem>>, vector<1x8xf32>
    %13 = vector.broadcast %12 : vector<1x8xf32> to vector<8x8xf32>
    %14 = arith.addf %11, %13 : vector<8x8xf32>
    %cst_11 = arith.constant dense<0xFF800000> : vector<8xf32>
    %15 = vector.multi_reduction <maximumf>, %14, %cst_11 [1] : vector<8x8xf32> to vector<8xf32>
    %16 = vector.shape_cast %15 : vector<8xf32> to vector<8x1xf32>
    %17 = vector.broadcast %16 : vector<8x1xf32> to vector<8x8xf32>
    %18 = arith.subf %14, %17 : vector<8x8xf32>
    %19 = math.exp %18 : vector<8x8xf32>
    %cst_12 = arith.constant dense<0.000000e+00> : vector<8xf32>
    %20 = vector.multi_reduction <add>, %19, %cst_12 [1] : vector<8x8xf32> to vector<8xf32>
    %21 = vector.shape_cast %20 : vector<8xf32> to vector<8x1xf32>
    %22 = tpu.reciprocal %21 {approx = true} : vector<8x1xf32> -> vector<8x1xf32>
    %23 = vector.broadcast %22 : vector<8x1xf32> to vector<8x8xf32>
    %24 = arith.mulf %19, %23 : vector<8x8xf32>
    %c0_13 = arith.constant 0 : index
    %c0_14 = arith.constant 0 : index
    %25 = vector.load %arg6[%c0_13, %c0_14] : memref<8x8xf32, #tpu.memory_space<vmem>>, vector<8x8xf32>
    tpu.vector_store %arg6[%c0_13, %c0_14], %24 {strides = array<i32>} : memref<8x8xf32, #tpu.memory_space<vmem>>, vector<8x8xf32>,
    return
  }
  func.func @transform_0(%arg0: i32) -> (i32, i32) {
    %c0_i32 = arith.constant 0 : i32
    %c0_i32_0 = arith.constant 0 : i32
    return %arg0, %c0_i32 : i32, i32
  }
  func.func @transform_1(%arg0: i32) -> (i32, i32) {
    %c0_i32 = arith.constant 0 : i32
    %c0_i32_0 = arith.constant 0 : i32
    %c0_i32_1 = arith.constant 0 : i32
    return %c0_i32, %c0_i32_0 : i32, i32
  }
  func.func @transform_2(%arg0: i32) -> (i32, i32) {
    %c0_i32 = arith.constant 0 : i32
    %c0_i32_0 = arith.constant 0 : i32
    %c0_i32_1 = arith.constant 0 : i32
    return %c0_i32, %c0_i32_0 : i32, i32
  }
  func.func @transform_3(%arg0: i32) -> (i32, i32) {
    %c0_i32 = arith.constant 0 : i32
    %c0_i32_0 = arith.constant 0 : i32
    %c0_i32_1 = arith.constant 0 : i32
    return %c0_i32, %c0_i32_0 : i32, i32
  }
  func.func @transform_4(%arg0: i32) -> (i32, i32) {
    %c0_i32 = arith.constant 0 : i32
    %c0_i32_0 = arith.constant 0 : i32
    %c0_i32_1 = arith.constant 0 : i32
    return %c0_i32, %c0_i32_0 : i32, i32
  }
  func.func @transform_5(%arg0: i32) -> (i32, i32) {
    %c0_i32 = arith.constant 0 : i32
    %c0_i32_0 = arith.constant 0 : i32
    return %arg0, %c0_i32 : i32, i32
  }
}

</mosaic_0001>

<bundles_post_ra>
// kernel: policy_net_forward.1
= control target key start
LH: loop header
LB: loop body
LE: loop exit
PB: predicated region body
PF: predicated region fallthrough
CT: control target
= control target key end

     0   :  { %vm36_vm0 = vcmask 130048   ;;  %s317_s0 = inlined_call_operand.vmem [shape: f32[8,16], index: 0, kind: input, shape index: {}]   ;;  %s318_s1 = inlined_call_operand.vmem [shape: bf16[16,128], index: 1, kind: input, shape index: {}]   ;;  %s319_s2 = inlined_call_operand.vmem [shape: f32[1,128], index: 2, kind: input, shape index: {}]   ;;  %s320_s3 = inlined_call_operand.vmem [shape: bf16[128,8], index: 3, kind: input, shape index: {}]   ;;  %s321_s4 = inlined_call_operand.vmem [shape: f32[1,8], index: 4, kind: input, shape index: {}]   ;;  %s322_s5 = inlined_call_operand.hbm [shape: f32[8,8], index: 5, kind: output, shape index: {}]  }
   0x1   :  { %v202_v0 = vld [vmem:[%s318_s1] sm:$0xff]  ;;  %v210_v2 = vld [vmem:[%s320_s3 + $0x38] sm:$0xff]  ;;  %v209_v4 = vld [vmem:[%s320_s3 + $0x30] sm:$0xff] }
   0x2   :  { %v22_v1 = vld [vmem:[%s317_s0] sm:$0xff]  ;;  %47 = vmatpush.bf16.msra.mxu0 %v202_v0  ;;  %123 = vmatpush.bf16.msra.mxu1 %v210_v2 }
   0x3   :  { %v23_v3 = vpack.c.bf16 %v22_v1, %v22_v1 }
   0x4   :  { %10 = vsyncpa [#allocation3], 0  ;;  %v208_v5 = vld [vmem:[%s320_s3 + $0x28] sm:$0xff]  ;;  %v207_v6 = vld [vmem:[%s320_s3 + $0x20] sm:$0xff]  ;;  %vm136_vm1 = vcmask 64512   ;;  %s156_s16 = sshll.u32 %s322_s5, 4  ;;  %s157_s16 = int_to_ptr.hbm [resolvable:$true] %s156_s16 }
   0x5   :  { %169 = vmatmul.msk.bf16.vlgmr.msra.gmra.mxu0 %vm36_vm0, %v23_v3  ;;  %v206_v7 = vld [vmem:[%s320_s3 + $0x18] sm:$0xff]  ;;  %v205_v8 = vld [vmem:[%s320_s3 + $0x10] sm:$0xff]  ;;  %v204_v9 = vld [vmem:[%s320_s3 + $0x8] sm:$0xff] }
   0x6   :  { %124 = vmatpush.bf16.msra.mxu1 %v209_v4  ;;  %v203_v10 = vld [vmem:[%s320_s3] sm:$0xff] }
   0x7   :  { %v212_v11 = vld [vmem:[%s319_s2] ss:$0 sm:$0xff]  ;;  %s244_s2 = smov [#allocation2]  }
   0x8   :  { %v213_v17 = vld [vmem:[%s321_s4] ss:$0 sm:$0xff]  ;;  %s154_s3 = sshll.u32 %s244_s2, 4  ;;  %s155_s3 = int_to_ptr.vmem [resolvable:$true] %s154_s3 }
   0xa   :  { %125 = vmatpush.bf16.msra.mxu1 %v208_v5 }
   0xe   :  { %126 = vmatpush.bf16.msra.mxu1 %v207_v6 }
  0x12   :  { %127 = vmatpush.bf16.msra.mxu1 %v206_v7 }
  0x16   :  { %128 = vmatpush.bf16.msra.mxu1 %v205_v8 }
  0x1a   :  { %129 = vmatpush.bf16.msra.mxu1 %v204_v9 }
  0x1e   :  { %130 = vmatpush.bf16.msra.mxu1 %v203_v10 }
  0x82   :  { %v49_v12 = vpop.f32.mrf.mxu0 }
  0x83   :  { %v50_v13 = vadd.f32 %v212_v11, %v49_v12 }
  0x85   :  { %v53_v14 = vmax.f32 %v50_v13, 0.0 }
  0x87   :  { %v54_v15 = vpack.c.bf16 %v53_v14, %v53_v14 }
  0x89   :  { %131 = vmatmul.bf16.vlgmr.msra.gmra.mxu1 %v54_v15 }
  0x8a   :  { %v51_v16 = vpop.f32.mrf.mxu0 }
 0x106   :  { %v132_v18 = vpop.f32.mrf.mxu1 }
 0x107   :  { %v133_v19 = vadd.f32 %v213_v17, %v132_v18 }
 0x109   :  { %v137_v20 = vsel %vm136_vm1, %v133_v19, -inf }
 0x10a   :  { %138 = vmax.xlane.f32.xlu0 %v137_v20 }
 0x10e   :  { %v134_v21 = vpop.f32.mrf.mxu1 }
 0x17d   :  { %v139_v22 = vpop.xlane.xlu0 %138 }
 0x17e   :  { %v140_v23 = vsub.f32 %v133_v19, %v139_v22 }
 0x180   :  { %v141_v24 = vmul.f32 1.442695, %v140_v23 }
 0x182   :  { %214 = vpow2.f32 %v141_v24 }
 0x188   :  { %v215_v25 = vpop.eup %214 }
 0x189   :  { %v143_v26 = vsel %vm136_vm1, %v215_v25, 0.0 }
 0x18a   :  { %144 = vadd.xlane.f32.xlu0 %v143_v26 }
 0x1fd   :  { %v145_v27 = vpop.xlane.xlu0 %144 }
 0x1fe   :  { %216 = vrcp.f32 %v145_v27 }
 0x204   :  { %v217_v28 = vpop.eup %216 }
 0x205   :  { %v147_v29 = vmul.f32 %v217_v28, %v215_v25 }
 0x207   :  { %148 = vst.msk [vmem:[#allocation2] sm:$0xff] %vm136_vm1, %v147_v29 }
 0x208   :  { %159 = dma.vmem_to_hbm [thread:$0]  %s155_s3, 128, %s157_s16, [#allocation3]  }
 0x209   :  { %242 = dma.done.wait [#allocation3], 128  }
 0x20a   :  { %243 = vsyncadd [#allocation3], 4294967168 }
 0x20b   :  { %164 = vsyncpa [#allocation3], 1 }

</bundles_post_ra>
